<compile_context>
chip_gen: v6e
topology: v6e:2x2x1
jax: 0.10.0
libtpu: 0.0.40
codegen_flags: <defaults>
</compile_context>

<pallas_src>
import jax
import jax.numpy as jnp
from jax.experimental import pallas as pl
from jax.experimental.pallas import tpu as pltpu

# ---------------- config (stand-ins for cfg.*) ----------------
ENC_DIM = 32           # cfg.ENC_DIM / cfg.CMD_DIM
CTX_DIM = 32           # cfg.CTX_DIM
CLS_DIM = 32           # cfg.OUT_CLASSIFIER_DIM
NUM_CHOICES = 8
MASK_PADUNK_IN_LOGITS = True

OUT_LANES = 128                      # lane-dense output slab width
MAX_B_TILE = 512
KB_VMEM_BUDGET = 16 * 1024 * 1024    # double-buffer budget; safe on v7x (64 MiB VMEM)


# ---------------- Pallas kernel ----------------
def _lcgn_head_kernel(kb_ref, q_ref, objn_ref, wpack_ref, bpack_ref, out_ref):
    E, D, CLS, C = ENC_DIM, CTX_DIM, CLS_DIM, NUM_CHOICES

    kb = kb_ref[...].astype(jnp.float32)            # (Bt, N, D)
    q = q_ref[...].astype(jnp.float32)              # (Bt, E)
    Bt, N, _ = kb.shape

    # ---- fused question projections (one MXU issue): q @ [Wq | Wo] ----
    w_qo = wpack_ref[0:E, 0:2 * D]                  # (E, 2D)
    b_qo = bpack_ref[0:1, 0:2 * D]                  # (1, 2D)
    qo = jnp.dot(q, w_qo, preferred_element_type=jnp.float32) + b_qo   # (Bt, 2D)
    proj_q = qo[:, 0:D]                             # SingleHop.proj_q(vecQuestions)
    eQ = qo[:, D:2 * D]                             # Classifier.outQuestion(vecQuestions)

    # ---- interactions = F.normalize(kb * proj_q[:, None, :], dim=-1) ----
    inter = kb * proj_q[:, None, :]                 # (Bt, N, D)
    sumsq = jnp.sum(inter * inter, axis=-1, keepdims=True)
    inv_norm = jax.lax.rsqrt(jnp.maximum(sumsq, 1e-24))   # == 1 / max(||x||, 1e-12)
    inter = inter * inv_norm

    # ---- raw_att = inter2att(interactions).squeeze(-1): VPU mul + lane reduce ----
    wa = bpack_ref[1:2, 0:D].reshape(1, 1, D)       # inter2att weight (width-1 matmul avoided)
    ba = bpack_ref[2:3, 0:1]                        # inter2att bias
    raw_att = jnp.sum(inter * wa, axis=-1) + ba     # (Bt, N)

    # ---- ops.apply_mask1d: positions >= imagesObjectNum -> -1e30 ----
    col = jax.lax.broadcasted_iota(jnp.int32, (Bt, N), 1)
    raw_att = jnp.where(col >= objn_ref[...], jnp.float32(-1e30), raw_att)

    # ---- softmax over objects (approx reciprocal -> EUP) ----
    m = jnp.max(raw_att, axis=-1, keepdims=True)
    e = jnp.exp(raw_att - m)
    att = e * pl.reciprocal(jnp.sum(e, axis=-1, keepdims=True), approx=True)

    # ---- x_att = bmm(att[:, None, :], kb).squeeze(1): VPU mul + sublane reduce ----
    x_att = jnp.sum(att[:, :, None] * kb, axis=1)   # (Bt, D)

    # ---- Classifier: concat-free [x, eQ, x*eQ] @ W1 (three accumulating matmuls) ----
    b1 = bpack_ref[3:4, 0:CLS]
    h = (jnp.dot(x_att, wpack_ref[E:E + D, 0:CLS], preferred_element_type=jnp.float32)
         + jnp.dot(eQ, wpack_ref[E + D:E + 2 * D, 0:CLS], preferred_element_type=jnp.float32)
         + jnp.dot(x_att * eQ, wpack_ref[E + 2 * D:E + 3 * D, 0:CLS],
                   preferred_element_type=jnp.float32)
         + b1)
    # ELU; exp(min(h,0))-1 equals exp(h)-1 on the selected branch and avoids inf waste.
    h = jnp.where(h > 0, h, jnp.exp(jnp.minimum(h, 0.0)) - 1.0)

    b2 = bpack_ref[4:5, 0:C]
    logits = jnp.dot(h, wpack_ref[E + 3 * D:E + 3 * D + CLS, 0:C],
                     preferred_element_type=jnp.float32) + b2          # (Bt, C)

    # ---- lane-dense (Bt, 128) output slab: x_att in [0, D), logits in [D, D+C) ----
    out_ref[...] = jnp.zeros_like(out_ref)
    out_ref[:, 0:D] = x_att
    out_ref[:, D:D + C] = logits


# ---------------- wrapper ----------------
def _pick_b_tile(B, n, d):
    """Largest batch tile that (a) keeps the double-buffered kb tile within the
    VMEM budget, (b) is a multiple of 8 (sublane), (c) divides B evenly."""
    row_bytes = (n * d + ENC_DIM + 1 + OUT_LANES) * 4 * 2   # double buffered
    cap = max(8, KB_VMEM_BUDGET // max(row_bytes, 1))
    cap = min(cap, MAX_B_TILE)
    if B <= cap:
        return B
    t = (cap // 8) * 8
    while t >= 8:
        if B % t == 0:
            return t
        t -= 8
    return B    # fallback: single block


def _pack_params(params):
    """Pack all weights/biases into two contiguous f32 buffers (2 DMA descriptors)."""
    E, D, CLS, C = ENC_DIM, CTX_DIM, CLS_DIM, NUM_CHOICES
    rows = E + 3 * D + CLS
    wpack = jnp.zeros((rows, OUT_LANES), jnp.float32)
    wpack = wpack.at[0:E, 0:D].set(params['wq'])
    wpack = wpack.at[0:E, D:2 * D].set(params['wo'])
    wpack = wpack.at[E:E + 3 * D, 0:CLS].set(params['w1'])
    wpack = wpack.at[E + 3 * D:E + 3 * D + CLS, 0:C].set(params['w2'])

    bpack = jnp.zeros((8, OUT_LANES), jnp.float32)
    bpack = bpack.at[0, 0:D].set(params['bq'].reshape(-1))
    bpack = bpack.at[0, D:2 * D].set(params['bo'].reshape(-1))
    bpack = bpack.at[1, 0:D].set(params['wa'].reshape(-1))
    bpack = bpack.at[2, 0].set(params['ba'].reshape(-1)[0])
    bpack = bpack.at[3, 0:CLS].set(params['b1'].reshape(-1))
    bpack = bpack.at[4, 0:C].set(params['b2'].reshape(-1))
    return wpack, bpack


def lcgn_head(kb, vec_q, images_object_num, params):
    """SingleHop + Classifier, fused into one Pallas call.

    kb: (B, N, CTX_DIM), vec_q: (B, ENC_DIM), images_object_num: (B,) int.
    Returns (x_att (B, CTX_DIM) f32, logits (B, NUM_CHOICES) f32).
    """
    B, N, D = kb.shape
    E = vec_q.shape[1]
    assert D == CTX_DIM and E == ENC_DIM
    objn = images_object_num.astype(jnp.int32).reshape(B, 1)
    wpack, bpack = _pack_params(params)

    b_tile = _pick_b_tile(B, N, D)
    grid = (B // b_tile,)

    in_specs = [
        pl.BlockSpec((b_tile, N, D), lambda i: (i, 0, 0)),       # kb
        pl.BlockSpec((b_tile, E), lambda i: (i, 0)),             # vecQuestions
        pl.BlockSpec((b_tile, 1), lambda i: (i, 0)),             # imagesObjectNum
        pl.BlockSpec(wpack.shape, lambda i: (0, 0)),             # packed weights
        pl.BlockSpec(bpack.shape, lambda i: (0, 0)),             # packed biases
    ]
    out_spec = pl.BlockSpec((b_tile, OUT_LANES), lambda i: (i, 0))

    # VMEM sizing (double-buffered tiles + resident packed weights) and cost hints.
    tile_bytes = 4 * (b_tile * (N * D + E + 1) + b_tile * OUT_LANES)
    weight_bytes = 4 * (wpack.size + bpack.size)
    vmem_needed = 2 * tile_bytes + 2 * weight_bytes
    vmem_limit = int(min(max(2 * vmem_needed, 16 * 1024 * 1024), 64 * 1024 * 1024))

    flops = int(2 * B * E * 2 * D + 8 * B * N * D
                + 2 * B * 3 * D * CLS_DIM + 2 * B * CLS_DIM * NUM_CHOICES)
    transcendentals = int(2 * B * N + B * CLS_DIM + B)
    bytes_accessed = int(4 * (kb.size + vec_q.size + objn.size
                              + wpack.size + bpack.size + B * OUT_LANES))

    out = pl.pallas_call(
        _lcgn_head_kernel,
        out_shape=jax.ShapeDtypeStruct((B, OUT_LANES), jnp.float32),
        grid=grid,
        in_specs=in_specs,
        out_specs=out_spec,
        compiler_params=pltpu.CompilerParams(
            dimension_semantics=("parallel",),
            vmem_limit_bytes=vmem_limit),
        cost_estimate=pl.CostEstimate(
            flops=flops, transcendentals=transcendentals,
            bytes_accessed=bytes_accessed),
    )(kb, vec_q, objn, wpack, bpack)

    x_att = out[:, :D]
    logits = out[:, D:D + NUM_CHOICES]
    return x_att, logits


# ---------------- glue: prediction + loss (plain JAX) ----------------
def add_pred_op(logits, answers):
    if MASK_PADUNK_IN_LOGITS:
        logits = logits.at[..., :2].add(-1e30)
    preds = jnp.argmax(logits, axis=-1)
    num_correct = jnp.sum(preds == answers)
    return preds, num_correct


def add_answer_loss_op(logits, answers):
    # cfg.TRAIN.LOSS_TYPE == 'softmax' -> F.cross_entropy
    logz = jax.nn.logsumexp(logits, axis=-1)
    picked = jnp.take_along_axis(logits, answers[:, None], axis=-1)[:, 0]
    return jnp.mean(logz - picked)


def lcgnnet_forward(batch, params):
    # batch layout mirrors LCGNnet.forward; Encoder/LCGN/BERT outputs are
    # provided directly (see TODO at top of file).
    kb = batch['x_out']                    # stand-in for self.lcgn(...)
    vec_q = batch['vecQuestions']          # stand-in for encoder output
    obj_num = batch['imagesObjectNum']
    answers = batch['answerIndices']
    batch_size = kb.shape[0]

    x_att, logits = lcgn_head(kb, vec_q, obj_num, params)
    preds, num_correct = add_pred_op(logits, answers)
    loss = add_answer_loss_op(logits, answers)
    return {
        'predictions': preds,
        'batch_size': int(batch_size),
        'num_correct': int(num_correct),
        'loss': loss,
        'accuracy': float(num_correct) / float(batch_size),
        'x_att': x_att,
        'logits': logits,
    }


# ---------------- params + pure-JAX reference (for verification) ----------------
def init_params(key):
    ks = jax.random.split(key, 10)

    def lin(k, fan_in, fan_out):
        return jax.random.normal(k, (fan_in, fan_out), jnp.float32) / jnp.sqrt(fan_in)

    return {
        # SingleHop.proj_q : Linear(ENC_DIM, CTX_DIM)
        'wq': lin(ks[0], ENC_DIM, CTX_DIM), 'bq': jnp.zeros((1, CTX_DIM), jnp.float32),
        # SingleHop.inter2att : Linear(CTX_DIM, 1)
        'wa': lin(ks[1], CTX_DIM, 1), 'ba': jnp.zeros((1, 1), jnp.float32),
        # Classifier.outQuestion : Linear(ENC_DIM, CTX_DIM)
        'wo': lin(ks[2], ENC_DIM, CTX_DIM), 'bo': jnp.zeros((1, CTX_DIM), jnp.float32),
        # Classifier MLP : Linear(3*CTX_DIM, CLS_DIM) -> ELU -> Linear(CLS_DIM, num_choices)
        'w1': lin(ks[3], 3 * CTX_DIM, CLS_DIM), 'b1': jnp.zeros((1, CLS_DIM), jnp.float32),
        'w2': lin(ks[4], CLS_DIM, NUM_CHOICES), 'b2': jnp.zeros((1, NUM_CHOICES), jnp.float32),
    }


def lcgn_head_ref(kb, vec_q, objn, params):
    proj_q = vec_q @ params['wq'] + params['bq']
    inter = kb * proj_q[:, None, :]
    nrm = jnp.sqrt(jnp.sum(inter * inter, axis=-1, keepdims=True))
    inter = inter / jnp.maximum(nrm, 1e-12)
    raw = jnp.einsum('bnd,dk->bnk', inter, params['wa'])[..., 0] + params['ba'][0, 0]
    col = jnp.arange(kb.shape[1])[None, :]
    raw = jnp.where(col >= objn[:, None], -1e30, raw)
    att = jax.nn.softmax(raw, axis=-1)
    x_att = jnp.einsum('bn,bnd->bd', att, kb)
    eQ = vec_q @ params['wo'] + params['bo']
    feats = jnp.concatenate([x_att, eQ, x_att * eQ], axis=-1)
    h = feats @ params['w1'] + params['b1']
    h = jnp.where(h > 0, h, jnp.exp(jnp.minimum(h, 0.0)) - 1.0)
    logits = h @ params['w2'] + params['b2']
    return x_att, logits


if __name__ == "__main__":
    key = jax.random.PRNGKey(0)
    k_p, k_kb, k_q, k_a = jax.random.split(key, 4)

    B, N = 2, 16
    params = init_params(k_p)
    batch = {
        'x_out': jax.random.normal(k_kb, (B, N, CTX_DIM), jnp.float32),
        'vecQuestions': jax.random.normal(k_q, (B, ENC_DIM), jnp.float32),
        'imagesObjectNum': jnp.array([16, 9], jnp.int32),
        'answerIndices': jax.random.randint(k_a, (B,), 2, NUM_CHOICES),
    }

    out = lcgnnet_forward(batch, params)
    jax.block_until_ready(out['loss'])
    jax.block_until_ready(out['predictions'])

    # verify against a pure-JAX reference
    x_ref, l_ref = lcgn_head_ref(batch['x_out'], batch['vecQuestions'],
                                 batch['imagesObjectNum'], params)
    err_x = float(jnp.max(jnp.abs(out['x_att'] - x_ref)))
    err_l = float(jnp.max(jnp.abs(out['logits'] - l_ref)))
    assert err_x < 1e-2 and err_l < 1e-2, (err_x, err_l)

    assert out['predictions'].shape == (B,)
    assert out['x_att'].shape == (B, CTX_DIM)
    assert bool(jnp.isfinite(out['loss']))
    print("KERNEL_OK")
</pallas_src>

<mosaic_0001>
module attributes {stable_mosaic.version = 11 : i64} {
  func.func @_lcgn_head_kernel(%arg0: i32, %arg1: memref<2x16x32xf32, #tpu.memory_space<vmem>>, %arg2: memref<2x32xf32, #tpu.memory_space<vmem>>, %arg3: memref<2x1xi32, #tpu.memory_space<vmem>>, %arg4: memref<160x128xf32, #tpu.memory_space<vmem>>, %arg5: memref<8x128xf32, #tpu.memory_space<vmem>>, %arg6: memref<2x128xf32, #tpu.memory_space<vmem>>) attributes {dimension_semantics = [#tpu.dimension_semantics<parallel>], iteration_bounds = array<i64: 1>, scalar_prefetch = 0 : i64, scratch_operands = 0 : i64, tpu.core_type = #tpu.core_type<tc>, window_params = [{transform_indices = @transform_0, window_bounds = array<i64: 2, 16, 32>}, {transform_indices = @transform_1, window_bounds = array<i64: 2, 32>}, {transform_indices = @transform_2, window_bounds = array<i64: 2, 1>}, {pipeline_mode = #tpu.pipeline_mode<synchronous>, transform_indices = @transform_3, window_bounds = array<i64: 160, 128>}, {pipeline_mode = #tpu.pipeline_mode<synchronous>, transform_indices = @transform_4, window_bounds = array<i64: 8, 128>}, {transform_indices = @transform_5, window_bounds = array<i64: 2, 128>}]} {
    %c0 = arith.constant 0 : index
    %c0_0 = arith.constant 0 : index
    %c0_1 = arith.constant 0 : index
    %0 = vector.load %arg1[%c0, %c0_0, %c0_1] : memref<2x16x32xf32, #tpu.memory_space<vmem>>, vector<2x16x32xf32>
    %c0_2 = arith.constant 0 : index
    %c0_3 = arith.constant 0 : index
    %1 = vector.load %arg2[%c0_2, %c0_3] : memref<2x32xf32, #tpu.memory_space<vmem>>, vector<2x32xf32>
    %c0_4 = arith.constant 0 : index
    %c0_5 = arith.constant 0 : index
    %2 = vector.load %arg4[%c0_4, %c0_5] : memref<160x128xf32, #tpu.memory_space<vmem>>, vector<32x64xf32>
    %c0_6 = arith.constant 0 : index
    %c0_7 = arith.constant 0 : index
    %3 = vector.load %arg5[%c0_6, %c0_7] : memref<8x128xf32, #tpu.memory_space<vmem>>, vector<1x64xf32>
    %cst = arith.constant dense<0.000000e+00> : vector<2x64xf32>
    %4 = tpu.matmul %1, %2, %cst {dimension_numbers = #tpu.dot_dimension_numbers<[1], [0], [0], [1], [0, 0, 1, 1], [], []>} : vector<2x32xf32>, vector<32x64xf32>, vector<2x64xf32> -> vector<2x64xf32>
    %5 = vector.broadcast %3 : vector<1x64xf32> to vector<2x64xf32>
    %6 = arith.addf %4, %5 : vector<2x64xf32>
    %7 = vector.extract_strided_slice %6 {offsets = [0, 0], sizes = [2, 32], strides = [1, 1]} : vector<2x64xf32> to vector<2x32xf32>
    %8 = vector.extract_strided_slice %6 {offsets = [0, 32], sizes = [2, 32], strides = [1, 1]} : vector<2x64xf32> to vector<2x32xf32>
    %9 = vector.shape_cast %7 : vector<2x32xf32> to vector<2x1x32xf32>
    %10 = vector.broadcast %9 : vector<2x1x32xf32> to vector<2x16x32xf32>
    %11 = arith.mulf %0, %10 : vector<2x16x32xf32>
    %12 = arith.mulf %11, %11 : vector<2x16x32xf32>
    %cst_8 = arith.constant dense<0.000000e+00> : vector<2x16xf32>
    %13 = vector.multi_reduction <add>, %12, %cst_8 [2] : vector<2x16x32xf32> to vector<2x16xf32>
    %14 = vector.shape_cast %13 : vector<2x16xf32> to vector<2x16x1xf32>
    %cst_9 = arith.constant 1.000000e-24 : f32
    %15 = vector.broadcast %cst_9 : f32 to vector<2x16x1xf32>
    %16 = arith.maximumf %14, %15 : vector<2x16x1xf32>
    %17 = math.rsqrt %16 : vector<2x16x1xf32>
    %18 = vector.broadcast %17 : vector<2x16x1xf32> to vector<2x16x32xf32>
    %19 = arith.mulf %11, %18 : vector<2x16x32xf32>
    %c1 = arith.constant 1 : index
    %c0_10 = arith.constant 0 : index
    %20 = vector.load %arg5[%c1, %c0_10] : memref<8x128xf32, #tpu.memory_space<vmem>>, vector<1x32xf32>
    %21 = vector.shape_cast %20 : vector<1x32xf32> to vector<1x1x32xf32>
    %c2 = arith.constant 2 : index
    %c0_11 = arith.constant 0 : index
    %22 = vector.load %arg5[%c2, %c0_11] : memref<8x128xf32, #tpu.memory_space<vmem>>, vector<1x1xf32>
    %23 = vector.broadcast %21 : vector<1x1x32xf32> to vector<2x16x32xf32>
    %24 = arith.mulf %19, %23 : vector<2x16x32xf32>
    %cst_12 = arith.constant dense<0.000000e+00> : vector<2x16xf32>
    %25 = vector.multi_reduction <add>, %24, %cst_12 [2] : vector<2x16x32xf32> to vector<2x16xf32>
    %26 = vector.broadcast %22 : vector<1x1xf32> to vector<2x16xf32>
    %27 = arith.addf %25, %26 : vector<2x16xf32>
    %28 = tpu.iota {dimensions = array<i32: 1>} : vector<2x16xi32>
    %c0_13 = arith.constant 0 : index
    %c0_14 = arith.constant 0 : index
    %29 = vector.load %arg3[%c0_13, %c0_14] : memref<2x1xi32, #tpu.memory_space<vmem>>, vector<2x1xi32>
    %30 = vector.broadcast %29 : vector<2x1xi32> to vector<2x16xi32>
    %31 = arith.cmpi sge, %28, %30 : vector<2x16xi32>
    %cst_15 = arith.constant -1.000000e+30 : f32
    %32 = vector.broadcast %cst_15 : f32 to vector<2x16xf32>
    %33 = arith.select %31, %32, %27 : vector<2x16xi1>, vector<2x16xf32>
    %cst_16 = arith.constant dense<0xFF800000> : vector<2xf32>
    %34 = vector.multi_reduction <maximumf>, %33, %cst_16 [1] : vector<2x16xf32> to vector<2xf32>
    %35 = vector.shape_cast %34 : vector<2xf32> to vector<2x1xf32>
    %36 = vector.broadcast %35 : vector<2x1xf32> to vector<2x16xf32>
    %37 = arith.subf %33, %36 : vector<2x16xf32>
    %38 = math.exp %37 : vector<2x16xf32>
    %cst_17 = arith.constant dense<0.000000e+00> : vector<2xf32>
    %39 = vector.multi_reduction <add>, %38, %cst_17 [1] : vector<2x16xf32> to vector<2xf32>
    %40 = vector.shape_cast %39 : vector<2xf32> to vector<2x1xf32>
    %41 = tpu.reciprocal %40 {approx = true} : vector<2x1xf32> -> vector<2x1xf32>
    %42 = vector.broadcast %41 : vector<2x1xf32> to vector<2x16xf32>
    %43 = arith.mulf %38, %42 : vector<2x16xf32>
    %44 = vector.shape_cast %43 : vector<2x16xf32> to vector<2x16x1xf32>
    %45 = vector.broadcast %44 : vector<2x16x1xf32> to vector<2x16x32xf32>
    %46 = arith.mulf %45, %0 : vector<2x16x32xf32>
    %cst_18 = arith.constant dense<0.000000e+00> : vector<2x32xf32>
    %47 = vector.multi_reduction <add>, %46, %cst_18 [1] : vector<2x16x32xf32> to vector<2x32xf32>
    %c3 = arith.constant 3 : index
    %c0_19 = arith.constant 0 : index
    %48 = vector.load %arg5[%c3, %c0_19] : memref<8x128xf32, #tpu.memory_space<vmem>>, vector<1x32xf32>
    %c32 = arith.constant 32 : index
    %c0_20 = arith.constant 0 : index
    %49 = vector.load %arg4[%c32, %c0_20] : memref<160x128xf32, #tpu.memory_space<vmem>>, vector<32x32xf32>
    %cst_21 = arith.constant dense<0.000000e+00> : vector<2x32xf32>
    %50 = tpu.matmul %47, %49, %cst_21 {dimension_numbers = #tpu.dot_dimension_numbers<[1], [0], [0], [1], [0, 0, 1, 1], [], []>} : vector<2x32xf32>, vector<32x32xf32>, vector<2x32xf32> -> vector<2x32xf32>
    %c64 = arith.constant 64 : index
    %c0_22 = arith.constant 0 : index
    %51 = vector.load %arg4[%c64, %c0_22] : memref<160x128xf32, #tpu.memory_space<vmem>>, vector<32x32xf32>
    %cst_23 = arith.constant dense<0.000000e+00> : vector<2x32xf32>
    %52 = tpu.matmul %8, %51, %cst_23 {dimension_numbers = #tpu.dot_dimension_numbers<[1], [0], [0], [1], [0, 0, 1, 1], [], []>} : vector<2x32xf32>, vector<32x32xf32>, vector<2x32xf32> -> vector<2x32xf32>
    %53 = arith.addf %50, %52 : vector<2x32xf32>
    %54 = arith.mulf %47, %8 : vector<2x32xf32>
    %c96 = arith.constant 96 : index
    %c0_24 = arith.constant 0 : index
    %55 = vector.load %arg4[%c96, %c0_24] : memref<160x128xf32, #tpu.memory_space<vmem>>, vector<32x32xf32>
    %cst_25 = arith.constant dense<0.000000e+00> : vector<2x32xf32>
    %56 = tpu.matmul %54, %55, %cst_25 {dimension_numbers = #tpu.dot_dimension_numbers<[1], [0], [0], [1], [0, 0, 1, 1], [], []>} : vector<2x32xf32>, vector<32x32xf32>, vector<2x32xf32> -> vector<2x32xf32>
    %57 = arith.addf %53, %56 : vector<2x32xf32>
    %58 = vector.broadcast %48 : vector<1x32xf32> to vector<2x32xf32>
    %59 = arith.addf %57, %58 : vector<2x32xf32>
    %cst_26 = arith.constant 0.000000e+00 : f32
    %60 = vector.broadcast %cst_26 : f32 to vector<2x32xf32>
    %61 = arith.cmpf ogt, %59, %60 : vector<2x32xf32>
    %cst_27 = arith.constant 0.000000e+00 : f32
    %62 = vector.broadcast %cst_27 : f32 to vector<2x32xf32>
    %63 = arith.minimumf %59, %62 : vector<2x32xf32>
    %64 = math.exp %63 : vector<2x32xf32>
    %cst_28 = arith.constant 1.000000e+00 : f32
    %65 = vector.broadcast %cst_28 : f32 to vector<2x32xf32>
    %66 = arith.subf %64, %65 : vector<2x32xf32>
    %67 = arith.select %61, %59, %66 : vector<2x32xi1>, vector<2x32xf32>
    %c4 = arith.constant 4 : index
    %c0_29 = arith.constant 0 : index
    %68 = vector.load %arg5[%c4, %c0_29] : memref<8x128xf32, #tpu.memory_space<vmem>>, vector<1x8xf32>
    %c128 = arith.constant 128 : index
    %c0_30 = arith.constant 0 : index
    %69 = vector.load %arg4[%c128, %c0_30] : memref<160x128xf32, #tpu.memory_space<vmem>>, vector<32x8xf32>
    %cst_31 = arith.constant dense<0.000000e+00> : vector<2x8xf32>
    %70 = tpu.matmul %67, %69, %cst_31 {dimension_numbers = #tpu.dot_dimension_numbers<[1], [0], [0], [1], [0, 0, 1, 1], [], []>} : vector<2x32xf32>, vector<32x8xf32>, vector<2x8xf32> -> vector<2x8xf32>
    %71 = vector.broadcast %68 : vector<1x8xf32> to vector<2x8xf32>
    %72 = arith.addf %70, %71 : vector<2x8xf32>
    %cst_32 = arith.constant 0.000000e+00 : f32
    %73 = vector.broadcast %cst_32 : f32 to vector<2x128xf32>
    %c0_33 = arith.constant 0 : index
    %c0_34 = arith.constant 0 : index
    %74 = vector.load %arg6[%c0_33, %c0_34] : memref<2x128xf32, #tpu.memory_space<vmem>>, vector<2x128xf32>
    tpu.vector_store %arg6[%c0_33, %c0_34], %73 {strides = array<i32>} : memref<2x128xf32, #tpu.memory_space<vmem>>, vector<2x128xf32>,
    %c0_35 = arith.constant 0 : index
    %c0_36 = arith.constant 0 : index
    %75 = vector.load %arg6[%c0_35, %c0_36] : memref<2x128xf32, #tpu.memory_space<vmem>>, vector<2x32xf32>
    tpu.vector_store %arg6[%c0_35, %c0_36], %47 {strides = array<i32>} : memref<2x128xf32, #tpu.memory_space<vmem>>, vector<2x32xf32>,
    %c0_37 = arith.constant 0 : index
    %c32_38 = arith.constant 32 : index
    %76 = vector.load %arg6[%c0_37, %c32_38] : memref<2x128xf32, #tpu.memory_space<vmem>>, vector<2x8xf32>
    tpu.vector_store %arg6[%c0_37, %c32_38], %72 {strides = array<i32>} : memref<2x128xf32, #tpu.memory_space<vmem>>, vector<2x8xf32>,
    return
  }
  func.func @transform_0(%arg0: i32) -> (i32, i32, i32) {
    %c0_i32 = arith.constant 0 : i32
    %c0_i32_0 = arith.constant 0 : i32
    %c0_i32_1 = arith.constant 0 : i32
    return %arg0, %c0_i32, %c0_i32_0 : i32, i32, i32
  }
  func.func @transform_1(%arg0: i32) -> (i32, i32) {
    %c0_i32 = arith.constant 0 : i32
    %c0_i32_0 = arith.constant 0 : i32
    return %arg0, %c0_i32 : i32, i32
  }
  func.func @transform_2(%arg0: i32) -> (i32, i32) {
    %c0_i32 = arith.constant 0 : i32
    %c0_i32_0 = arith.constant 0 : i32
    return %arg0, %c0_i32 : i32, i32
  }
  func.func @transform_3(%arg0: i32) -> (i32, i32) {
    %c0_i32 = arith.constant 0 : i32
    %c0_i32_0 = arith.constant 0 : i32
    %c0_i32_1 = arith.constant 0 : i32
    return %c0_i32, %c0_i32_0 : i32, i32
  }
  func.func @transform_4(%arg0: i32) -> (i32, i32) {
    %c0_i32 = arith.constant 0 : i32
    %c0_i32_0 = arith.constant 0 : i32
    %c0_i32_1 = arith.constant 0 : i32
    return %c0_i32, %c0_i32_0 : i32, i32
  }
  func.func @transform_5(%arg0: i32) -> (i32, i32) {
    %c0_i32 = arith.constant 0 : i32
    %c0_i32_0 = arith.constant 0 : i32
    return %arg0, %c0_i32 : i32, i32
  }
}

</mosaic_0001>

<bundles_post_ra>
// kernel: tpu_custom_call.1
= control target key start
LH: loop header
LB: loop body
LE: loop exit
PB: predicated region body
PF: predicated region fallthrough
CT: control target
= control target key end

     0   :  { %10 = vsyncpa [#allocation3], 0  ;;  %s1029_s0 = inlined_call_operand.hbm [shape: f32[2,16,32], index: 0, kind: input, shape index: {}]   ;;  %s1030_s1 = inlined_call_operand.vmem [shape: f32[2,32], index: 1, kind: input, shape index: {}]   ;;  %s1031_s2 = inlined_call_operand.vmem [shape: s32[2,1], index: 2, kind: input, shape index: {}]   ;;  %s1032_s3 = inlined_call_operand.hbm [shape: f32[160,128], index: 3, kind: input, shape index: {}]   ;;  %s1033_s4 = inlined_call_operand.vmem [shape: f32[8,128], index: 4, kind: input, shape index: {}]   ;;  %s1034_s5 = inlined_call_operand.hbm [shape: f32[2,128], index: 5, kind: output, shape index: {}]  }
   0x1   :  { %11 = vsyncpa [#allocation6], 0 }
   0x2   :  { %12 = vsyncpa [#allocation4], 0  ;;  %s872_s18 = smov [#allocation2]  }
   0x3   :  { %s18_s19 = sshll.u32 %s872_s18, 4  ;;  %s19_s19 = int_to_ptr.vmem [resolvable:$true] %s18_s19 }
   0x4   :  { %s814_s20 = scalar_lea.vmem %s19_s19, 512  ;;  %p819_p1 = scmp.lt.s32.totalorder %s19_s19, %s19_s19 }
   0x5   :  { %p815_p0 = scmp.ne.s32.totalorder %s19_s19, %s814_s20  ;;  %p820_p2 = scmp.lt.s32.totalorder %s814_s20, %s814_s20 }
   0x7   :  { %p821_p3 = por %p820_p2, %p819_p1 }
   0x9   :  { %p822_p4 = pnand %p821_p3, %p815_p0 }
   0xb   :  { %825 = shalt.err (!%p822_p4)
}
   0xc   :  { %s873_s21 = smov 128   ;;  %s874_s22 = smov 8  }
   0xd   :  { %24 = dma.hbm_to_vmem [thread:$0]  %s1029_s0, 512, %s19_s19, [#allocation3], %s873_s21, %s873_s21, %s874_s22  }
   0xe   :  { %s875_s25 = smov [#allocation5]  }
   0xf   :  { %s34_s26 = sshll.u32 %s875_s25, 4  ;;  %s35_s26 = int_to_ptr.vmem [resolvable:$true] %s34_s26 }
  0x10   :  { %s834_s27 = scalar_lea.vmem %s35_s26, 2560  ;;  %p839_p6 = scmp.lt.s32.totalorder %s35_s26, %s35_s26 }
  0x11   :  { %p835_p5 = scmp.ne.s32.totalorder %s35_s26, %s834_s27  ;;  %p840_p7 = scmp.lt.s32.totalorder %s834_s27, %s834_s27 }
  0x13   :  { %p841_p8 = por %p840_p7, %p839_p6 }
  0x15   :  { %p842_p9 = pnand %p841_p8, %p835_p5 }
  0x17   :  { %845 = shalt.err (!%p842_p9)
}
  0x18   :  { %40 = dma.hbm_to_vmem [thread:$0]  %s1032_s3, 2560, %s35_s26, [#allocation6], %s873_s21, %s873_s21, %s874_s22  }
  0x19   :  { %866 = dma.done.wait [#allocation3], 512  }
  0x1a   :  { %867 = vsyncadd [#allocation3], 4294966784 }
  0x1b   :  { %868 = dma.done.wait [#allocation6], 2560  }
  0x1c   :  { %869 = vsyncadd [#allocation6], 4294964736  ;;  %v876_v0 = vmov 0.0   ;;  %vm877_vm0 = vmmov 0   ;;  %v57_v1 = vld [vmem:[#allocation5 + $0x18] sm:$0xff]  ;;  %v56_v2 = vld [vmem:[#allocation5 + $0x10] sm:$0xff]  ;;  %v141_v8 = vlaneseq }
  0x1d   :  { %723 = vmatprep.subr.mxu0 %v876_v0  ;;  %662 = vst [vmem:[#allocation7] sm:$0x3] %v876_v0  ;;  %731 = vmatprep.mubr.msk.f32.mxu0 %vm877_vm0, %v876_v0  ;;  %v55_v3 = vld [vmem:[#allocation5 + $0x8] sm:$0xff]  ;;  %v54_v4 = vld [vmem:[#allocation5] sm:$0xff]  ;;  %vm63_vm1 = vcmask 261120   ;;  %v954_v24 = vld [vmem:[#allocation2 + $0x10] sm:$0xff] }
  0x1e   :  { %734 = vmatprep.subr.mxu1 %v876_v0  ;;  %742 = vmatprep.mubr.msk.f32.mxu1 %vm877_vm0, %v876_v0  ;;  %v53_v5 = vld [vmem:[%s1030_s1] sm:$0x3]  ;;  %v878_v6 = vmov 1966171168   ;;  %v937_v10 = vshrl.u32 %v141_v8, 7  ;;  %v951_v21 = vld [vmem:[#allocation2 + $0x8] sm:$0xff] }
  0x1f   :  { %724 = vmatpush3.msra.mxu0 %v57_v1  ;;  %v139_v7 = vunpack.c.l.s4 %v878_v6  ;;  %v688_v11 = vld [vmem:[%s1033_s4] ss:$0 sm:$0xff]  ;;  %v956_v25 = vld [vmem:[#allocation2 + $0x18] sm:$0xff]  ;;  %v879_v39 = vmov 0   ;;  %v203_v40 = vld [vmem:[%s1033_s4 + $0x2] sm:$0x1] }
  0x20   :  { %725 = vmatprep.subr.mxu0 %v876_v0  ;;  %v947_v17 = vsub.s32 0, %v937_v10  ;;  %v949_v20 = vld [vmem:[#allocation2] sm:$0xff]  ;;  %791 = vset.pattern.permute.xlu0 %v879_v39  ;;  %778 = vpush %v203_v40  ;;  %vm252_vm2 = vcmask 130112   ;;  %vm263_vm3 = vcmask 1041409   ;;  %vm267_vm5 = vcmask 123904   ;;  %s881_s17 = smov 32  }
  0x21   :  { %726 = vmatpush3.msra.mxu0 %v56_v2  ;;  %v140_v9 = vunpack.c.0.s8 %v139_v7  ;;  %v690_v50 = vld [vmem:[%s1033_s4 + $0x1] ss:$0 sm:$0xff]  ;;  %v292_v40 = vsub.s32 1, %v937_v10  ;;  %vm664_vm6 = vcmask 254976   ;;  %s882_s18 = smov [#allocation7]   ;;  %vm670_vm8 = vcmask 320768  }
  0x22   :  { %727 = vmatprep.subr.mxu0 %v876_v0  ;;  %s678_s19 = sshll.u32 %s882_s18, 4  ;;  %s679_s19 = int_to_ptr.vmem [resolvable:$true] %s678_s19 }
  0x23   :  { %728 = vmatpush3.msra.mxu0 %v55_v3  ;;  %v143_v12 = vsub.s32 %v140_v9, %v937_v10  ;;  %v234_v3 = vld [vmem:[%s1031_s2] sm:$0x3]  ;;  %s880_s2 = smov 96   ;;  %s846_s20 = scalar_lea.vmem %s679_s19, 32 }
  0x24   :  { %729 = vmatprep.subr.mxu0 %v876_v0  ;;  %p847_p10 = scmp.ne.s32.totalorder %s679_s19, %s846_s20  ;;  %p851_p11 = scmp.lt.s32.totalorder %s679_s19, %s679_s19 }
  0x25   :  { %730 = vmatpush3.msra.mxu0 %v54_v4  ;;  %v233_v4 = vand.u32 127, %v141_v8  ;;  %p852_p12 = scmp.lt.s32.totalorder %s846_s20, %s846_s20 }
  0x26   :  { %732 = vmatmul.mubr.msk.f32.vlgmr.msra.gmra.mxu0 %vm63_vm1, %v53_v5  ;;  %745 = vmatprep.subr.mxu0 %v876_v0 }
  0x27   :  { %753 = vmatprep.mubr.msk.f32.mxu0 %vm877_vm0, %v876_v0  ;;  %v247_v6 = vadd.s32 4294967288, %v233_v4  ;;  %p853_p13 = por %p852_p12, %p851_p11 }
  0x29   :  { %p854_p0 = pnand %p853_p13, %p847_p10 }
  0x51   :  { %s779_s12 = spop %778 }
  0x52   :  { %v226_v7 = vstv %s779_s12 }
  0xe6   :  { %v133_v13 = vpop.f32.mrf.mxu0 }
  0xe7   :  { %v943_v14 = vadd.f32 %v688_v11, %v133_v13 }
  0xe8   :  { %v733_v15 = vpop.f32.mrf.mxu0 }
  0xe9   :  { %v144_v16 = vrot.slane %v943_v14, %v143_v12  ;;  %v245_v15 = vsub.s32 %v233_v4, %v937_v10 }
  0xeb   :  { %v145_v18 = vcombine.high %v144_v16, %v144_v16  ;;  %v152_v19 = vrot.slane %v144_v16, %v143_v12 }
  0xed   :  { %v163_v22 = vrot.slane %v152_v19, %v947_v17  ;;  %v159_v23 = vrot.slane %v145_v18, %v143_v12  ;;  %v250_v12 = vsub.s32 %v247_v6, %v937_v10  ;;  %v490_v6 = vld [vmem:[#allocation5 + $0x70] sm:$0xff] }
  0xef   :  { %v170_v26 = vmul.f32 %v163_v22, %v949_v20  ;;  %v167_v27 = vrot.slane %v159_v23, %v947_v17  ;;  %v171_v28 = vmul.f32 %v163_v22, %v951_v21 }
  0xf1   :  { %v174_v29 = vmul.f32 %v170_v26, %v170_v26  ;;  %v172_v30 = vmul.f32 %v167_v27, %v954_v24  ;;  %v173_v31 = vmul.f32 %v167_v27, %v956_v25  ;;  %v175_v34 = vmul.f32 %v171_v28, %v171_v28 }
  0xf3   :  { %v178_v32 = vsel %vm63_vm1, %v174_v29, 0.0  ;;  %v176_v33 = vmul.f32 %v172_v30, %v172_v30  ;;  %v177_v36 = vmul.f32 %v173_v31, %v173_v31  ;;  %v181_v37 = vsel %vm63_vm1, %v175_v34, 0.0 }
  0xf4   :  { %179 = vadd.xlane.f32.xlu0 %v178_v32 }
  0xf5   :  { %v184_v35 = vsel %vm63_vm1, %v176_v33, 0.0  ;;  %v187_v38 = vsel %vm63_vm1, %v177_v36, 0.0 }
  0xf6   :  { %185 = vadd.xlane.f32.xlu1 %v184_v35 }
  0xf8   :  { %182 = vadd.xlane.f32.xlu0 %v181_v37 }
  0xfa   :  { %188 = vadd.xlane.f32.xlu1 %v187_v38 }
 0x17d   :  { %v180_v41 = vpop.xlane.xlu0 %179 }
 0x17e   :  { %v190_v42 = vmax.f32 %v180_v41, 1e-24 }
 0x17f   :  { %v186_v43 = vpop.xlane.xlu1 %185 }
 0x180   :  { %792 = vrsqrt.f32 %v190_v42  ;;  %v192_v44 = vmax.f32 %v186_v43, 1e-24  ;;  %v331_v42 = vld [vmem:[#allocation5 + $0x58] sm:$0xff] }
 0x181   :  { %v183_v45 = vpop.xlane.xlu0 %182  ;;  %735 = vmatpush3.msra.mxu1 %v331_v42 }
 0x182   :  { %794 = vrsqrt.f32 %v192_v44  ;;  %v191_v46 = vmax.f32 %v183_v45, 1e-24  ;;  %736 = vmatprep.subr.mxu1 %v876_v0  ;;  %v330_v44 = vld [vmem:[#allocation5 + $0x50] sm:$0xff] }
 0x183   :  { %v189_v47 = vpop.xlane.xlu1 %188  ;;  %737 = vmatpush3.msra.mxu1 %v330_v44 }
 0x184   :  { %796 = vrsqrt.f32 %v191_v46  ;;  %v193_v48 = vmax.f32 %v189_v47, 1e-24  ;;  %738 = vmatprep.subr.mxu1 %v876_v0  ;;  %v329_v46 = vld [vmem:[#allocation5 + $0x48] sm:$0xff]  ;;  %v328_v47 = vld [vmem:[#allocation5 + $0x40] sm:$0xff] }
 0x185   :  { %739 = vmatpush3.msra.mxu1 %v329_v46  ;;  %v696_v46 = vld [vmem:[%s1033_s4 + $0x4] ss:$0 sm:$0xff] }
 0x186   :  { %798 = vrsqrt.f32 %v193_v48  ;;  %740 = vmatprep.subr.mxu1 %v876_v0  ;;  %v327_v48 = vld [vmem:[#allocation5 + $0x38] sm:$0xff] }
 0x187   :  { %741 = vmatpush3.msra.mxu1 %v328_v47  ;;  %746 = vmatpush3.msra.mxu0 %v327_v48 }
 0x188   :  { %756 = vmatprep.subr.mxu1 %v876_v0  ;;  %747 = vmatprep.subr.mxu0 %v876_v0 }
 0x18d   :  { %v793_v49 = vpop.eup %792 }
 0x18e   :  { %v198_v51 = vmul.f32 %v793_v49, %v170_v26  ;;  %v326_v49 = vld [vmem:[#allocation5 + $0x30] sm:$0xff] }
 0x18f   :  { %v795_v52 = vpop.eup %794  ;;  %748 = vmatpush3.msra.mxu0 %v326_v49 }
 0x190   :  { %v208_v53 = vmul.f32 %v690_v50, %v198_v51  ;;  %v200_v54 = vmul.f32 %v795_v52, %v172_v30  ;;  %749 = vmatprep.subr.mxu0 %v876_v0  ;;  %v324_v51 = vld [vmem:[#allocation5 + $0x20] sm:$0xff] }
 0x191   :  { %v797_v55 = vpop.eup %796 }
 0x192   :  { %v212_v56 = vsel %vm63_vm1, %v208_v53, 0.0  ;;  %v210_v57 = vmul.f32 %v690_v50, %v200_v54  ;;  %v199_v58 = vmul.f32 %v797_v55, %v171_v28 }
 0x193   :  { %v799_v59 = vpop.eup %798  ;;  %213 = vadd.xlane.f32.xlu0 %v212_v56 }
 0x194   :  { %v209_v60 = vmul.f32 %v690_v50, %v199_v58  ;;  %v201_v61 = vmul.f32 %v799_v59, %v173_v31  ;;  %v218_v62 = vsel %vm63_vm1, %v210_v57, 0.0 }
 0x196   :  { %v215_v63 = vsel %vm63_vm1, %v209_v60, 0.0  ;;  %v211_v1 = vmul.f32 %v690_v50, %v201_v61  ;;  %v325_v50 = vld [vmem:[#allocation5 + $0x28] sm:$0xff] }
 0x197   :  { %219 = vadd.xlane.f32.xlu0 %v218_v62  ;;  %216 = vadd.xlane.f32.xlu1 %v215_v63 }
 0x198   :  { %v221_v2 = vsel %vm63_vm1, %v211_v1, 0.0  ;;  %750 = vmatpush3.msra.mxu0 %v325_v50 }
 0x199   :  { %751 = vmatprep.subr.mxu0 %v876_v0 }
 0x19a   :  { %752 = vmatpush3.msra.mxu0 %v324_v51 }
 0x19b   :  { %222 = vadd.xlane.f32.xlu1 %v221_v2  ;;  %767 = vmatprep.subr.mxu0 %v876_v0 }
 0x1ad   :  { %236 = vperm.xlu0 %791, %v234_v3   ;;  %v491_v3 = vld [vmem:[#allocation5 + $0x78] sm:$0xff] }
 0x21c   :  { %v214_v5 = vpop.xlane.xlu0 %213 }
 0x21d   :  { %v228_v16 = vadd.f32 %v226_v7, %v214_v5 }
 0x21f   :  { %v246_v26 = vrot.slane %v228_v16, %v245_v15 }
 0x220   :  { %v217_v9 = vpop.xlane.xlu1 %216  ;;  %v220_v11 = vpop.xlane.xlu0 %219 }
 0x221   :  { %v229_v13 = vadd.f32 %v226_v7, %v217_v9  ;;  %v230_v18 = vadd.f32 %v226_v7, %v220_v11  ;;  %v488_v11 = vld [vmem:[#allocation5 + $0x60] sm:$0xff] }
 0x223   :  { %v251_v22 = vrot.slane %v229_v13, %v250_v12  ;;  %v257_v27 = vrot.slane %v230_v18, %v245_v15 }
 0x224   :  { %v223_v19 = vpop.xlane.xlu1 %222 }
 0x225   :  { %v231_v23 = vadd.f32 %v226_v7, %v223_v19  ;;  %v253_v29 = vsel %vm252_vm2, %v251_v22, %v246_v26 }
 0x227   :  { %v261_v8 = vrot.slane %v231_v23, %v250_v12 }
 0x228   :  { %v237_v28 = vpop.permute.xlu0 %236 }
 0x229   :  { %vm238_vm4 = vcmp.ge.s32.totalorder %v233_v4, %v237_v28  ;;  %v262_v30 = vsel %vm252_vm2, %v261_v8, %v257_v27  ;;  %v584_v28 = vld [vmem:[#allocation5 + $0x98] sm:$0xff] }
 0x22a   :  { %v264_v31 = vsel %vm263_vm3, %v262_v30, %v253_v29  ;;  %v583_v29 = vld [vmem:[#allocation5 + $0x90] sm:$0xff]  ;;  %v582_v30 = vld [vmem:[#allocation5 + $0x88] sm:$0xff] }
 0x22b   :  { %v266_v32 = vsel %vm238_vm4, -1e+30, %v264_v31  ;;  %v581_v31 = vld [vmem:[#allocation5 + $0x80] sm:$0xff] }
 0x22c   :  { %v268_v33 = vsel %vm267_vm5, %v266_v32, -inf }
 0x22d   :  { %269 = vmax.xlane.f32.xlu1 %v268_v33 }
 0x2b6   :  { %v270_v34 = vpop.xlane.xlu1 %269 }
 0x2b7   :  { %v271_v35 = vsub.f32 %v266_v32, %v270_v34 }
 0x2b9   :  { %v272_v36 = vmul.f32 1.442695, %v271_v35 }
 0x2bb   :  { %800 = vpow2.f32 %v272_v36 }
 0x2c8   :  { %v801_v37 = vpop.eup %800 }
 0x2c9   :  { %v274_v38 = vsel %vm267_vm5, %v801_v37, 0.0 }
 0x2ca   :  { %275 = vadd.xlane.f32.xlu1 %v274_v38 }
 0x353   :  { %v276_v39 = vpop.xlane.xlu1 %275 }
 0x354   :  { %802 = vrcp.f32 %v276_v39 }
 0x361   :  { %v803_v41 = vpop.eup %802 }
 0x362   :  { %v278_v43 = vmul.f32 %v803_v41, %v801_v37  ;;  %v694_v37 = vld [vmem:[%s1033_s4 + $0x3] ss:$0 sm:$0xff] }
 0x364   :  { %v293_v45 = vrot.slane %v278_v43, %v292_v40  ;;  %v282_v10 = vrot.slane %v278_v43, %v947_v17  ;;  %v481_v17 = vrot.slane %v943_v14, 1 }
 0x366   :  { %295 = vbcast.lane.b32.xlu1 %v293_v45, 256 }
 0x36a   :  { %299 = vbcast.lane.b32.xlu1 %v293_v45, 264 }
 0x36e   :  { %284 = vbcast.lane.b32.xlu1 %v282_v10, 256 }
 0x372   :  { %288 = vbcast.lane.b32.xlu1 %v282_v10, 264 }
 0x376   :  { %332 = vrot.lane.b32.xlu1 %v943_v14, %s880_s2 }
 0x37a   :  { %482 = vrot.lane.b32.xlu1 %v481_v17, %s880_s2 }
 0x3d8   :  { %v296_v52 = vpop.permute.xlu1 %295 }
 0x3d9   :  { %v303_v53 = vmul.f32 %v296_v52, %v954_v24 }
 0x3db   :  { %v314_v56 = vsel %vm63_vm1, %v303_v53, 0.0 }
 0x3dc   :  { %v300_v54 = vpop.permute.xlu1 %299 }
 0x3dd   :  { %v304_v55 = vmul.f32 %v300_v54, %v956_v25 }
 0x3df   :  { %v315_v57 = vsel %vm63_vm1, %v304_v55, 0.0 }
 0x3e0   :  { %v316_v58 = vadd.f32 %v315_v57, %v314_v56  ;;  %v285_v59 = vpop.permute.xlu1 %284 }
 0x3e1   :  { %v301_v61 = vmul.f32 %v285_v59, %v949_v20  ;;  %v489_v20 = vld [vmem:[#allocation5 + $0x68] sm:$0xff] }
 0x3e2   :  { %v317_v60 = vrot.slane %v316_v58, 4 }
 0x3e3   :  { %v305_v2 = vsel %vm63_vm1, %v301_v61, 0.0 }
 0x3e4   :  { %v318_v62 = vadd.f32 %v317_v60, %v316_v58  ;;  %v289_v63 = vpop.permute.xlu1 %288 }
 0x3e5   :  { %v302_v14 = vmul.f32 %v289_v63, %v951_v21 }
 0x3e6   :  { %v319_v1 = vrot.slane %v318_v62, 2 }
 0x3e7   :  { %v306_v24 = vsel %vm63_vm1, %v302_v14, 0.0 }
 0x3e8   :  { %v307_v25 = vadd.f32 %v306_v24, %v305_v2  ;;  %v333_v4 = vpop.permute.xlu1 %332  ;;  %v320_v5 = vadd.f32 %v319_v1, %v318_v62 }
 0x3e9   :  { %743 = vmatmul.mubr.msk.f32.vlgmr.msra.gmra.mxu1 %vm63_vm1, %v333_v4 }
 0x3ea   :  { %v308_v7 = vrot.slane %v307_v25, 4  ;;  %v321_v9 = vrot.slane %v320_v5, 1  ;;  %757 = vmatpush3.msra.mxu1 %v491_v3  ;;  %764 = vmatprep.mubr.msk.f32.mxu1 %vm877_vm0, %v876_v0 }
 0x3eb   :  { %758 = vmatprep.subr.mxu1 %v876_v0 }
 0x3ec   :  { %v309_v21 = vadd.f32 %v308_v7, %v307_v25  ;;  %759 = vmatpush3.msra.mxu1 %v490_v6  ;;  %v322_v13 = vadd.f32 %v321_v9, %v320_v5  ;;  %v483_v15 = vpop.permute.xlu1 %482 }
 0x3ed   :  { %760 = vmatprep.subr.mxu1 %v876_v0 }
 0x3ee   :  { %v310_v12 = vrot.slane %v309_v21, 2  ;;  %761 = vmatpush3.msra.mxu1 %v489_v20  ;;  %v487_v19 = vmul.f32 %v483_v15, %v322_v13 }
 0x3ef   :  { %762 = vmatprep.subr.mxu1 %v876_v0 }
 0x3f0   :  { %v311_v16 = vadd.f32 %v310_v12, %v309_v21  ;;  %763 = vmatpush3.msra.mxu1 %v488_v11  ;;  %v494_v26 = vrot.slane %v487_v19, 7 }
 0x3f2   :  { %v312_v18 = vrot.slane %v311_v16, 1 }
 0x3f4   :  { %v313_v22 = vadd.f32 %v312_v18, %v311_v16 }
 0x3f6   :  { %v486_v23 = vmul.f32 %v333_v4, %v313_v22  ;;  %v408_v27 = vsel %vm263_vm3, %v322_v13, %v313_v22 }
 0x3f7   :  { %754 = vmatmul.mubr.msk.f32.vlgmr.msra.gmra.mxu0 %vm63_vm1, %v408_v27  ;;  %665 = vst.msk [vmem:[#allocation7] sm:$0x3] %vm664_vm6, %v408_v27 }
 0x3f8   :  { %v495_v8 = vsel %vm263_vm3, %v494_v26, %v486_v23  ;;  %775 = vmatprep.mubr.msk.f32.mxu0 %vm877_vm0, %v876_v0  ;;  %768 = vmatpush3.msra.mxu0 %v584_v28 }
 0x3f9   :  { %765 = vmatmul.mubr.msk.f32.vlgmr.msra.gmra.mxu1 %vm63_vm1, %v495_v8  ;;  %769 = vmatprep.subr.mxu0 %v876_v0 }
 0x3fa   :  { %770 = vmatpush3.msra.mxu0 %v583_v29 }
 0x3fb   :  { %771 = vmatprep.subr.mxu0 %v876_v0 }
 0x3fc   :  { %772 = vmatpush3.msra.mxu0 %v582_v30 }
 0x3fd   :  { %773 = vmatprep.subr.mxu0 %v876_v0 }
 0x3fe   :  { %774 = vmatpush3.msra.mxu0 %v581_v31 }
 0x4a9   :  { %v402_v32 = vpop.f32.mrf.mxu1 }
 0x4ab   :  { %v744_v33 = vpop.f32.mrf.mxu1 }
 0x4b7   :  { %v477_v34 = vpop.f32.mrf.mxu0 }
 0x4b8   :  { %v478_v35 = vadd.f32 %v477_v34, %v402_v32 }
 0x4b9   :  { %v755_v36 = vpop.f32.mrf.mxu0  ;;  %v564_v38 = vpop.f32.mrf.mxu1 }
 0x4ba   :  { %v568_v39 = vadd.f32 %v564_v38, %v478_v35 }
 0x4bb   :  { %v766_v40 = vpop.f32.mrf.mxu1 }
 0x4bc   :  { %v573_v41 = vadd.f32 %v694_v37, %v568_v39 }
 0x4be   :  { %v575_v42 = vmin.f32 %v573_v41, 0.0  ;;  %vm574_vm7 = vcmp.gt.f32.partialorder %v573_v41, 0.0 }
 0x4c0   :  { %v576_v43 = vmul.f32 1.442695, %v575_v42 }
 0x4c2   :  { %804 = vpow2.f32 %v576_v43 }
 0x4cf   :  { %v805_v44 = vpop.eup %804 }
 0x4d0   :  { %v695_v45 = vadd.f32 -1.0, %v805_v44 }
 0x4d2   :  { %v579_v0 = vsel %vm574_vm7, %v573_v41, %v695_v45 }
 0x4d3   :  { %776 = vmatmul.mubr.msk.f32.vlgmr.msra.gmra.mxu0 %vm63_vm1, %v579_v0 }
 0x593   :  { %v658_v47 = vpop.f32.mrf.mxu0 }
 0x594   :  { %v659_v10 = vadd.f32 %v696_v46, %v658_v47 }
 0x595   :  { %v777_v48 = vpop.f32.mrf.mxu0 }
 0x596   :  { %667 = vrot.lane.b32.xlu0 %v659_v10, %s881_s17 }
 0x608   :  { %v668_v49 = vpop.permute.xlu0 %667 }
 0x609   :  { %671 = vst.msk [vmem:[#allocation7] sm:$0x3] %vm670_vm8, %v668_v49 }
 0x60a   :  { %857 = shalt.err (!%p854_p0)
}
 0x60b   :  { %681 = dma.vmem_to_hbm [thread:$0]  %s679_s19, 32, %s1034_s5, [#allocation4]  }
 0x60c   :  { %870 = dma.done.wait [#allocation4], 32  }
 0x60d   :  { %871 = vsyncadd [#allocation4], 4294967264 }
 0x60e   :  { %685 = vsyncpa [#allocation3], 1 }
 0x60f   :  { %686 = vsyncpa [#allocation6], 1 }
 0x610   :  { %687 = vsyncpa [#allocation4], 1 }

</bundles_post_ra>
